<compile_context>
chip_gen: v5e
topology: v5e:2x2
jax: 0.10.0
libtpu: 0.0.40
codegen_flags: <defaults>
</compile_context>

<pallas_src>
import jax
import jax.numpy as jnp
from jax.experimental import pallas as pl
from jax.experimental.pallas import tpu as pltpu


C_HALF = 64            # channels per branch (fixed by Conv2d(64, 64, 1))
C_FULL = 2 * C_HALF    # 128 total channels


def _scm_kernel(x_ref, w_ref, b_ref, o_ref):
    # x_ref : [128, t_hw]   channels x spatial tile (lanes = spatial)
    # w_ref : [128, 128]    block-diagonal 1x1-conv weight, [out, in] (matmul dtype)
    # b_ref : [128, 1]      fused bias (f32)
    # o_ref : [128, t_hw]
    x = x_ref[...]
    xm = x if x.dtype == w_ref.dtype else x.astype(w_ref.dtype)
    y = jnp.dot(w_ref[...], xm, preferred_element_type=jnp.float32) + b_ref[...]
    # Modulate in f32 with the ORIGINAL x; cast once on store.
    o_ref[...] = (x.astype(jnp.float32) * jax.nn.sigmoid(y)).astype(o_ref.dtype)


def _pick_hw_tile(hw, n_batch, target):
    """Pick a lane-friendly spatial tile.

    * full extent when hw <= target (always a legal block dim),
    * otherwise the largest multiple of 128 <= target, preferring an exact
      divisor of hw when one is close (avoids a wasteful partial tail),
    * and guarantees >= 2 total grid steps when possible so v7x's two
      TensorCores both get work.
    Partial last tiles are handled by Pallas's implicit masking (t % 128 == 0).
    """
    target = max(128, int(target))
    if hw <= target:
        t = hw
    else:
        t = (target // 128) * 128
        if hw % 128 == 0:
            d = t
            while d > 128 and hw % d != 0:
                d -= 128
            if hw % d == 0 and 2 * d >= t:   # only accept near-target divisors
                t = d
    # Ensure the (parallel x parallel) grid has >= 2 steps for v7x's 2 TCs.
    if n_batch * pl.cdiv(hw, t) < 2:
        if hw % 256 == 0:
            t = hw // 2                       # exact, lane-aligned halves
        elif hw > 2 * 128:
            t = pl.cdiv(hw, 2 * 128) * 128    # ~half, lane-aligned, 2 steps
        # else: spatial extent too small to split profitably; 1 step is fine.
    return t


def fuse_scm_params(w1, b1, w2, b2, *, matmul_dtype=jnp.bfloat16):
    """Fuse the two 1x1 convs into a block-diagonal weight + concatenated bias.

    Call this ONCE per parameter set and pass the result via `fused_params`
    (keeps the per-call launch path free of the zeros/at.set/concat chain).
    """
    w_bd = jnp.zeros((C_FULL, C_FULL), dtype=matmul_dtype)
    w_bd = w_bd.at[:C_HALF, :C_HALF].set(w1.astype(matmul_dtype))
    w_bd = w_bd.at[C_HALF:, C_HALF:].set(w2.astype(matmul_dtype))
    b_bd = jnp.concatenate([b1, b2]).astype(jnp.float32).reshape(C_FULL, 1)
    return w_bd, b_bd


def scm_forward(x_nchw, w1=None, b1=None, w2=None, b2=None, *,
                fused_params=None, hw_tile=8192,
                matmul_dtype=jnp.bfloat16, donate_input=False):
    """x_nchw: [N, 128, H, W]. w*: [64(out), 64(in)] 1x1-conv weights, b*: [64].

    Output dtype == input dtype (pass bf16 activations to halve HBM traffic).
    """
    N, C, H, W = x_nchw.shape
    assert C == C_FULL, f"expected {C_FULL} channels, got {C}"
    HW = H * W
    dtype = x_nchw.dtype

    if fused_params is None:
        fused_params = fuse_scm_params(w1, b1, w2, b2, matmul_dtype=matmul_dtype)
    w_bd, b_bd = fused_params

    # NCHW -> [N, C, H*W] is a free reshape (no transpose, no extra HBM pass).
    x3 = x_nchw.reshape(N, C_FULL, HW)

    t = _pick_hw_tile(HW, N, hw_tile)
    grid = (N, pl.cdiv(HW, t))

    # VMEM budget: double-buffered input + output tiles + resident weights/bias
    # + headroom.  Must exceed the default scoped limit (16/32 MiB) for the
    # larger tiles; stays below v7x's 64 MiB physical VMEM.
    blk_bytes = C_FULL * t * jnp.dtype(dtype).itemsize
    vmem_bytes = int(min(max(4 * blk_bytes + (4 << 20), 24 << 20), 60 << 20))

    out3 = pl.pallas_call(
        _scm_kernel,
        out_shape=jax.ShapeDtypeStruct((N, C_FULL, HW), dtype),
        grid_spec=pltpu.PrefetchScalarGridSpec(
            num_scalar_prefetch=0,
            grid=grid,
            in_specs=[
                # x tile: squeeze batch dim, channels on sublanes, spatial on lanes.
                pl.BlockSpec((None, C_FULL, t), lambda n, j: (n, 0, j)),
                # weight + bias: constant index map -> VMEM-resident across steps.
                pl.BlockSpec((C_FULL, C_FULL), lambda n, j: (0, 0)),
                pl.BlockSpec((C_FULL, 1), lambda n, j: (0, 0)),
            ],
            out_specs=pl.BlockSpec((None, C_FULL, t), lambda n, j: (n, 0, j)),
        ),
        compiler_params=pltpu.CompilerParams(
            dimension_semantics=("parallel", "parallel"),
            vmem_limit_bytes=vmem_bytes),
        # Identity per-tile dependence -> safe to alias x with the output
        # (saves an activation-sized HBM buffer); opt-in since the caller may
        # still need x afterwards.
        input_output_aliases=({0: 0} if donate_input else {}),
    )(x3, w_bd, b_bd)

    return out3.reshape(N, C_FULL, H, W)


def _reference(x_nchw, w1, b1, w2, b2):
    """Pure-JAX reference of the PyTorch forward (for sanity check)."""
    x1 = x_nchw[:, :C_HALF]
    x2 = x_nchw[:, C_HALF:]

    def conv1x1(x, w, b):
        # x: [N,64,H,W], w: [64(out),64(in)], b: [64]
        return jnp.einsum("nchw,oc->nohw", x, w) + b[None, :, None, None]

    x_up = jax.nn.sigmoid(conv1x1(x1, w1, b1))
    x_down = jax.nn.sigmoid(conv1x1(x2, w2, b2))
    return jnp.concatenate([x1 * x_up, x2 * x_down], axis=1)


if __name__ == "__main__":
    key = jax.random.PRNGKey(0)
    k_x, k_w1, k_b1, k_w2, k_b2, k_xb, k_xc = jax.random.split(key, 7)

    # Conv2d(64, 64, 1): weight [64,64,1,1] -> stored as [64(out),64(in)]; bias [64].
    bound = 1.0 / (C_HALF ** 0.5)  # PyTorch default init bound for fan_in=64
    w1 = jax.random.uniform(k_w1, (C_HALF, C_HALF), minval=-bound, maxval=bound,
                            dtype=jnp.float32)
    b1 = jax.random.uniform(k_b1, (C_HALF,), minval=-bound, maxval=bound,
                            dtype=jnp.float32)
    w2 = jax.random.uniform(k_w2, (C_HALF, C_HALF), minval=-bound, maxval=bound,
                            dtype=jnp.float32)
    b2 = jax.random.uniform(k_b2, (C_HALF,), minval=-bound, maxval=bound,
                            dtype=jnp.float32)

    # --- Test A: default fast path (bf16 matmul operands, f32 modulate/IO) ---
    N, H, W = 2, 8, 8
    x = jax.random.normal(k_x, (N, C_FULL, H, W), dtype=jnp.float32)
    fused_bf16 = fuse_scm_params(w1, b1, w2, b2)   # hoisted: built once per params
    out = jax.block_until_ready(scm_forward(x, fused_params=fused_bf16))
    ref = jax.block_until_ready(_reference(x, w1, b1, w2, b2))
    assert out.shape == (N, C_FULL, H, W), out.shape
    assert jnp.allclose(out, ref, atol=5e-2, rtol=5e-2), "bf16 path mismatch"

    # --- Test B: exact f32 matmul + partial (masked) spatial tail ------------
    xb = jax.random.normal(k_xb, (1, C_FULL, 10, 20), dtype=jnp.float32)  # HW=200
    out_b = jax.block_until_ready(
        scm_forward(xb, w1, b1, w2, b2, hw_tile=128, matmul_dtype=jnp.float32))
    ref_b = _reference(xb, w1, b1, w2, b2)
    assert jnp.allclose(out_b, ref_b, atol=1e-5, rtol=1e-5), "tail path mismatch"

    # --- Test C: exact f32 matmul + >=2-grid-step backoff for N=1 ------------
    xc = jax.random.normal(k_xc, (1, C_FULL, 32, 32), dtype=jnp.float32)  # HW=1024
    out_c = jax.block_until_ready(
        scm_forward(xc, w1, b1, w2, b2, matmul_dtype=jnp.float32))
    ref_c = _reference(xc, w1, b1, w2, b2)
    assert jnp.allclose(out_c, ref_c, atol=1e-5, rtol=1e-5), "split path mismatch"

    print("KERNEL_OK")
</pallas_src>

<mosaic_0001>
module attributes {stable_mosaic.version = 11 : i64} {
  func.func @_scm_kernel(%arg0: i32, %arg1: i32, %arg2: memref<1x128x64xf32, #tpu.memory_space<vmem>>, %arg3: memref<128x128xbf16, #tpu.memory_space<vmem>>, %arg4: memref<128x1xf32, #tpu.memory_space<vmem>>, %arg5: memref<1x128x64xf32, #tpu.memory_space<vmem>>) attributes {dimension_semantics = [#tpu.dimension_semantics<parallel>, #tpu.dimension_semantics<parallel>], iteration_bounds = array<i64: 2, 1>, scalar_prefetch = 0 : i64, scratch_operands = 0 : i64, tpu.core_type = #tpu.core_type<tc>, window_params = [{transform_indices = @transform_0, window_bounds = array<i64: 1, 128, 64>}, {pipeline_mode = #tpu.pipeline_mode<synchronous>, transform_indices = @transform_1, window_bounds = array<i64: 128, 128>}, {pipeline_mode = #tpu.pipeline_mode<synchronous>, transform_indices = @transform_2, window_bounds = array<i64: 128, 1>}, {transform_indices = @transform_3, window_bounds = array<i64: 1, 128, 64>}]} {
    %c0 = arith.constant 0 : index
    %c0_0 = arith.constant 0 : index
    %c0_1 = arith.constant 0 : index
    %0 = vector.load %arg2[%c0, %c0_0, %c0_1] : memref<1x128x64xf32, #tpu.memory_space<vmem>>, vector<1x128x64xf32>
    %1 = vector.shape_cast %0 : vector<1x128x64xf32> to vector<128x64xf32>
    %2 = arith.truncf %1 : vector<128x64xf32> to vector<128x64xbf16>
    %c0_2 = arith.constant 0 : index
    %c0_3 = arith.constant 0 : index
    %3 = vector.load %arg3[%c0_2, %c0_3] : memref<128x128xbf16, #tpu.memory_space<vmem>>, vector<128x128xbf16>
    %cst = arith.constant dense<0.000000e+00> : vector<128x64xf32>
    %4 = tpu.matmul %3, %2, %cst {dimension_numbers = #tpu.dot_dimension_numbers<[1], [0], [0], [1], [0, 0, 1, 1], [], []>} : vector<128x128xbf16>, vector<128x64xbf16>, vector<128x64xf32> -> vector<128x64xf32>
    %c0_4 = arith.constant 0 : index
    %c0_5 = arith.constant 0 : index
    %5 = vector.load %arg4[%c0_4, %c0_5] : memref<128x1xf32, #tpu.memory_space<vmem>>, vector<128x1xf32>
    %6 = vector.broadcast %5 : vector<128x1xf32> to vector<128x64xf32>
    %7 = arith.addf %4, %6 : vector<128x64xf32>
    %8 = arith.negf %7 : vector<128x64xf32>
    %9 = math.exp %8 : vector<128x64xf32>
    %cst_6 = arith.constant 1.000000e+00 : f32
    %10 = vector.broadcast %cst_6 : f32 to vector<128x64xf32>
    %11 = arith.addf %10, %9 : vector<128x64xf32>
    %12 = arith.divf %10, %11 : vector<128x64xf32>
    %13 = arith.mulf %1, %12 : vector<128x64xf32>
    %c0_7 = arith.constant 0 : index
    %c0_8 = arith.constant 0 : index
    %c0_9 = arith.constant 0 : index
    %14 = vector.load %arg5[%c0_7, %c0_8, %c0_9] : memref<1x128x64xf32, #tpu.memory_space<vmem>>, vector<1x128x64xf32>
    %15 = vector.shape_cast %14 : vector<1x128x64xf32> to vector<128x64xf32>
    %16 = vector.shape_cast %13 : vector<128x64xf32> to vector<1x128x64xf32>
    tpu.vector_store %arg5[%c0_7, %c0_8, %c0_9], %16 {strides = array<i32>} : memref<1x128x64xf32, #tpu.memory_space<vmem>>, vector<1x128x64xf32>,
    return
  }
  func.func @transform_0(%arg0: i32, %arg1: i32) -> (i32, i32, i32) {
    %c0_i32 = arith.constant 0 : i32
    %c0_i32_0 = arith.constant 0 : i32
    return %arg0, %c0_i32, %arg1 : i32, i32, i32
  }
  func.func @transform_1(%arg0: i32, %arg1: i32) -> (i32, i32) {
    %c0_i32 = arith.constant 0 : i32
    %c0_i32_0 = arith.constant 0 : i32
    %c0_i32_1 = arith.constant 0 : i32
    return %c0_i32, %c0_i32_0 : i32, i32
  }
  func.func @transform_2(%arg0: i32, %arg1: i32) -> (i32, i32) {
    %c0_i32 = arith.constant 0 : i32
    %c0_i32_0 = arith.constant 0 : i32
    %c0_i32_1 = arith.constant 0 : i32
    return %c0_i32, %c0_i32_0 : i32, i32
  }
  func.func @transform_3(%arg0: i32, %arg1: i32) -> (i32, i32, i32) {
    %c0_i32 = arith.constant 0 : i32
    %c0_i32_0 = arith.constant 0 : i32
    return %arg0, %c0_i32, %arg1 : i32, i32, i32
  }
}

</mosaic_0001>

<bundles_post_ra>
// kernel: tpu_custom_call.1
= control target key start
LH: loop header
LB: loop body
LE: loop exit
PB: predicated region body
PF: predicated region fallthrough
CT: control target
= control target key end

     0   :  { %s1085_s12 = smov 0   ;;  %s1087_s13 = smov 0   ;;  %s1518_s0 = inlined_call_operand.vmem [shape: f32[2,128,64], index: 0, kind: input, shape index: {}]   ;;  %s1519_s1 = inlined_call_operand.vmem [shape: bf16[128,128], index: 1, kind: input, shape index: {}]   ;;  %s1520_s2 = inlined_call_operand.vmem [shape: f32[128,1], index: 2, kind: input, shape index: {}]   ;;  %s1521_s3 = inlined_call_operand.vmem [shape: f32[2,128,64], index: 3, kind: output, shape index: {}]  }
   0x1   :  { %s1089_s14 = smov 0  }
   0x2 LB: > { %s25_s15 = sadd.s32 1, %s1058_s13  ;;  %p859_p0 = scmp.ge.s32.totalorder %s1062_s14, 1  ;;  %s1062_s14 = sphi %s1089_s14, %s13_s14   ;;  %s1058_s13 = sphi %s1087_s13, %s1541_s13   ;;  %s1054_s12 = sphi %s1085_s12, %s1540_s12  }
   0x3   : > { %p27_p1 = scmp.ge.s32.totalorder %s25_s15, 2  ;;  %p156_p2 = scmp.lt.s32.totalorder %s1062_s14, 3 }
   0x5   : > { %s1543_s15 = smov (%p27_p1, %s25_s15), 0  ;;  %p157_p3 = pnand %p859_p0, %p156_p2 }
   0x6   : > { %p186_p4 = scmp.lt.s32.totalorder (!%p157_p3), %s1054_s12, 1 }
   0x7   : > { %160 = sbr.rel (%p157_p3) target bundleno = 264 (0x108), region = 32 }
   0xc   : > { %v242_v0 = vld [vmem:[%s1520_s2] sm:$0xff]  ;;  %v244_v1 = vld [vmem:[%s1520_s2 + $0x10] sm:$0xff]  ;;  %v1064_v2 = vmov 0   ;;  %s1545_s12 = smov (!%p186_p4, %s1054_s12), 1  ;;  %v243_v8 = vld [vmem:[%s1520_s2 + $0x8] sm:$0xff]  ;;  %vm755_vm3 = vcmask 523264  }
   0xd   : > { %973 = vset.pattern.permute.xlu0 %v1064_v2  ;;  %974 = vset.pattern.permute.xlu1 %v1064_v2  ;;  %s914_s20 = sshll.u32 %s1545_s12, 7  ;;  %v245_v9 = vld [vmem:[%s1520_s2 + $0x18] sm:$0xff]  ;;  %v246_v13 = vld [vmem:[%s1520_s2 + $0x20] sm:$0xff]  ;;  %v248_v17 = vld [vmem:[%s1520_s2 + $0x30] sm:$0xff] }
   0xe   : > { %260 = vperm.xlu0 %973, %v242_v0   ;;  %270 = vperm.xlu1 %974, %v244_v1   ;;  %s1117_s23 = scalar_lea.vmem %s1518_s0, %s914_s20  ;;  %v249_v18 = vld [vmem:[%s1520_s2 + $0x38] sm:$0xff]  ;;  %v247_v22 = vld [vmem:[%s1520_s2 + $0x28] sm:$0xff]  ;;  %v252_v27 = vld [vmem:[%s1520_s2 + $0x50] sm:$0xff]  ;;  %s1316_s26 = scalar_lea.vmem %s1521_s3, %s914_s20 }
   0xf   : > { %975 = vset.pattern.permute.xlu2 %v1064_v2  ;;  %v1120_v3 = vld [vmem:[%s1117_s23 + $0x70] sm:$0xff]  ;;  %v1123_v4 = vld [vmem:[%s1117_s23 + $0x78] sm:$0xff]  ;;  %v1126_v5 = vld [vmem:[%s1117_s23 + $0x60] sm:$0xff] }
  0x10   : > { %v225_v6 = vpack.c.bf16 %v1123_v4, %v1120_v3  ;;  %v1131_v7 = vld [vmem:[%s1117_s23 + $0x68] sm:$0xff]  ;;  %v1142_v11 = vld [vmem:[%s1117_s23 + $0x50] sm:$0xff]  ;;  %v1145_v12 = vld [vmem:[%s1117_s23 + $0x58] sm:$0xff]  ;;  %280 = vperm.xlu2 %975, %v246_v13  }
  0x11   : > { %v224_v10 = vpack.c.bf16 %v1131_v7, %v1126_v5  ;;  %v223_v14 = vpack.c.bf16 %v1145_v12, %v1142_v11  ;;  %v1153_v15 = vld [vmem:[%s1117_s23 + $0x40] sm:$0xff]  ;;  %v1156_v16 = vld [vmem:[%s1117_s23 + $0x48] sm:$0xff]  ;;  %v1167_v20 = vld [vmem:[%s1117_s23 + $0x30] sm:$0xff] }
  0x12   : > { %386 = vmatpush.bf16.msra.mxu0 %v225_v6  ;;  %924 = vmatpush.bf16.msra.mxu1 %v225_v6  ;;  %v222_v19 = vpack.c.bf16 %v1156_v16, %v1153_v15  ;;  %v1170_v21 = vld [vmem:[%s1117_s23 + $0x38] sm:$0xff]  ;;  %v1178_v24 = vld [vmem:[%s1117_s23 + $0x20] sm:$0xff]  ;;  %v1181_v25 = vld [vmem:[%s1117_s23 + $0x28] sm:$0xff] }
  0x13   : > { %925 = vmatpush.bf16.msra.mxu2 %v225_v6  ;;  %926 = vmatpush.bf16.msra.mxu3 %v225_v6  ;;  %v221_v23 = vpack.c.bf16 %v1170_v21, %v1167_v20  ;;  %v251_v26 = vld [vmem:[%s1520_s2 + $0x48] sm:$0xff]  ;;  %v220_v28 = vpack.c.bf16 %v1181_v25, %v1178_v24  ;;  %v1192_v29 = vld [vmem:[%s1117_s23 + $0x10] sm:$0xff]  ;;  %v1195_v30 = vld [vmem:[%s1117_s23 + $0x18] sm:$0xff] }
  0x14   : > { %v250_v31 = vld [vmem:[%s1520_s2 + $0x40] sm:$0xff]  ;;  %v219_v32 = vpack.c.bf16 %v1195_v30, %v1192_v29  ;;  %v1206_v34 = vld [vmem:[%s1117_s23 + $0x8] sm:$0xff]  ;;  %v918_v39 = vld [vmem:[%s1519_s1 + $0x10] sm:$0xff] }
  0x15   : > { %v1203_v33 = vld [vmem:[%s1117_s23] sm:$0xff]  ;;  %v255_v36 = vld [vmem:[%s1520_s2 + $0x68] sm:$0xff]  ;;  %v253_v40 = vld [vmem:[%s1520_s2 + $0x58] sm:$0xff] }
  0x16   : > { %265 = vperm.xlu0 %973, %v243_v8   ;;  %275 = vperm.xlu1 %974, %v245_v9   ;;  %v254_v35 = vld [vmem:[%s1520_s2 + $0x60] sm:$0xff]  ;;  %v218_v37 = vpack.c.bf16 %v1206_v34, %v1203_v33  ;;  %v922_v42 = vld [vmem:[%s1519_s1 + $0x30] sm:$0xff]  ;;  %v257_v43 = vld [vmem:[%s1520_s2 + $0x78] sm:$0xff] }
  0x17   : > { %387 = vmatpush.bf16.msra.mxu0 %v224_v10  ;;  %927 = vmatpush.bf16.msra.mxu1 %v224_v10  ;;  %v916_v38 = vld [vmem:[%s1519_s1] sm:$0xff]  ;;  %v256_v44 = vld [vmem:[%s1520_s2 + $0x70] sm:$0xff]  ;;  %v917_v45 = vld [vmem:[%s1519_s1 + $0x8] sm:$0xff] }
  0x18   : > { %928 = vmatpush.bf16.msra.mxu2 %v224_v10  ;;  %929 = vmatpush.bf16.msra.mxu3 %v224_v10  ;;  %v920_v41 = vld [vmem:[%s1519_s1 + $0x20] sm:$0xff]  ;;  %v919_v46 = vld [vmem:[%s1519_s1 + $0x18] sm:$0xff]  ;;  %v921_v47 = vld [vmem:[%s1519_s1 + $0x28] sm:$0xff] }
  0x19   : > { %285 = vperm.xlu2 %975, %v247_v22   ;;  %v923_v48 = vld [vmem:[%s1519_s1 + $0x38] sm:$0xff] }
  0x1b   : > { %388 = vmatpush.bf16.msra.mxu0 %v223_v14  ;;  %930 = vmatpush.bf16.msra.mxu1 %v223_v14 }
  0x1c   : > { %931 = vmatpush.bf16.msra.mxu2 %v223_v14  ;;  %932 = vmatpush.bf16.msra.mxu3 %v223_v14 }
  0x1e   : > { %290 = vperm.xlu0 %973, %v248_v17   ;;  %295 = vperm.xlu1 %974, %v249_v18  }
  0x1f   : > { %389 = vmatpush.bf16.msra.mxu0 %v222_v19  ;;  %933 = vmatpush.bf16.msra.mxu1 %v222_v19 }
  0x20   : > { %934 = vmatpush.bf16.msra.mxu2 %v222_v19  ;;  %935 = vmatpush.bf16.msra.mxu3 %v222_v19 }
  0x21   : > { %300 = vperm.xlu2 %975, %v250_v31  }
  0x23   : > { %390 = vmatpush.bf16.msra.mxu0 %v221_v23  ;;  %936 = vmatpush.bf16.msra.mxu1 %v221_v23 }
  0x24   : > { %937 = vmatpush.bf16.msra.mxu2 %v221_v23  ;;  %938 = vmatpush.bf16.msra.mxu3 %v221_v23 }
  0x26   : > { %305 = vperm.xlu0 %973, %v251_v26   ;;  %310 = vperm.xlu1 %974, %v252_v27  }
  0x27   : > { %391 = vmatpush.bf16.msra.mxu0 %v220_v28  ;;  %939 = vmatpush.bf16.msra.mxu1 %v220_v28 }
  0x28   : > { %940 = vmatpush.bf16.msra.mxu2 %v220_v28  ;;  %941 = vmatpush.bf16.msra.mxu3 %v220_v28 }
  0x29   : > { %315 = vperm.xlu2 %975, %v253_v40  }
  0x2b   : > { %392 = vmatpush.bf16.msra.mxu0 %v219_v32  ;;  %942 = vmatpush.bf16.msra.mxu1 %v219_v32 }
  0x2c   : > { %943 = vmatpush.bf16.msra.mxu2 %v219_v32  ;;  %944 = vmatpush.bf16.msra.mxu3 %v219_v32 }
  0x2e   : > { %320 = vperm.xlu0 %973, %v254_v35   ;;  %325 = vperm.xlu1 %974, %v255_v36  }
  0x2f   : > { %393 = vmatpush.bf16.msra.mxu0 %v218_v37  ;;  %945 = vmatpush.bf16.msra.mxu1 %v218_v37 }
  0x30   : > { %946 = vmatpush.bf16.msra.mxu2 %v218_v37  ;;  %947 = vmatpush.bf16.msra.mxu3 %v218_v37 }
  0x31   : > { %330 = vperm.xlu2 %975, %v256_v44  }
  0x32   : > { %394 = vmatmul.bf16.vlgmr.msra.gmra.mxu0 %v916_v38  ;;  %404 = vmatmul.bf16.vlgmr.msra.gmra.mxu1 %v918_v39 }
  0x33   : > { %414 = vmatmul.bf16.vlgmr.msra.gmra.mxu2 %v920_v41  ;;  %424 = vmatmul.bf16.vlgmr.msra.gmra.mxu3 %v922_v42 }
  0x36   : > { %335 = vperm.xlu0 %973, %v257_v43  }
  0x42   : > { %399 = vmatmul.bf16.gmra.mxu0 %v917_v45  ;;  %409 = vmatmul.bf16.gmra.mxu1 %v919_v46 }
  0x43   : > { %419 = vmatmul.bf16.gmra.mxu2 %v921_v47  ;;  %429 = vmatmul.bf16.gmra.mxu3 %v923_v48 }
  0x6a   : > { %v281_v52 = vpop.permute.xlu2 %280 }
  0x73   : > { %v286_v55 = vpop.permute.xlu2 %285 }
  0x7b   : > { %v301_v0 = vpop.permute.xlu2 %300 }
  0x80   : > { %v261_v49 = vpop.permute.xlu0 %260  ;;  %v271_v51 = vpop.permute.xlu1 %270 }
  0x88   : > { %v266_v50 = vpop.permute.xlu0 %265  ;;  %v1251_v54 = vpop.permute.xlu1 %275 }
  0x90   : > { %v1249_v53 = vpop.permute.xlu0 %290  ;;  %v1253_v57 = vpop.permute.xlu1 %295 }
  0x98   : > { %v306_v56 = vpop.permute.xlu0 %305  ;;  %v1255_v2 = vpop.permute.xlu1 %310 }
  0xa0   : > { %v321_v1 = vpop.permute.xlu0 %320  ;;  %v326_v38 = vpop.permute.xlu1 %325 }
  0xaf   : > { %v395_v58 = vpop.f32.mrf.mxu0  ;;  %v405_v59 = vpop.f32.mrf.mxu1 }
  0xb0   : > { %v396_v60 = vadd.f32 %v395_v58, %v261_v49  ;;  %v406_v61 = vadd.f32 %v405_v59, %v281_v52 }
  0xb2   : > { %v896_v62 = vmul.f32 -1.442695, %v396_v60  ;;  %v900_v63 = vmul.f32 -1.442695, %v406_v61 }
  0xb4   : > { %976 = vpow2.f32 %v896_v62 }
  0xb5   : > { %978 = vpow2.f32 %v900_v63 }
  0xb6   : > { %v415_v6 = vpop.f32.mrf.mxu2  ;;  %v425_v8 = vpop.f32.mrf.mxu3 }
  0xb7   : > { %v416_v9 = vadd.f32 %v415_v6, %v301_v0  ;;  %v426_v10 = vadd.f32 %v425_v8, %v321_v1  ;;  %v397_v13 = vpop.f32.mrf.mxu0  ;;  %v407_v14 = vpop.f32.mrf.mxu1 }
  0xb8   : > { %v398_v17 = vadd.f32 %v397_v13, %v266_v50  ;;  %v408_v18 = vadd.f32 %v407_v14, %v286_v55 }
  0xb9   : > { %v904_v19 = vmul.f32 -1.442695, %v416_v9  ;;  %v908_v22 = vmul.f32 -1.442695, %v426_v10 }
  0xba   : > { %v977_v23 = vpop.eup %976  ;;  %v897_v28 = vmul.f32 -1.442695, %v398_v17  ;;  %v901_v32 = vmul.f32 -1.442695, %v408_v18 }
  0xbb   : > { %v979_v26 = vpop.eup %978  ;;  %v1257_v27 = vadd.f32 1.0, %v977_v23  ;;  %980 = vpow2.f32 %v904_v19 }
  0xbc   : > { %v1259_v31 = vadd.f32 1.0, %v979_v26  ;;  %982 = vpow2.f32 %v908_v22 }
  0xbd   : > { %984 = vrcp.f32 %v1257_v27  ;;  %v508_v39 = vand.u32 2147483647, %v1257_v27  ;;  %v510_v40 = vand.u32 2147483648, %v1257_v27  ;;  %vm504_vm0 = vweird.f32 %v1257_v27 }
  0xbe   : > { %986 = vrcp.f32 %v1259_v31  ;;  %v417_v35 = vpop.f32.mrf.mxu2  ;;  %v427_v36 = vpop.f32.mrf.mxu3  ;;  %v568_v43 = vand.u32 2147483647, %v1259_v31  ;;  %v570_v47 = vand.u32 2147483648, %v1259_v31  ;;  %vm564_vm1 = vweird.f32 %v1259_v31 }
  0xbf   : > { %988 = vpow2.f32 %v897_v28  ;;  %v418_v37 = vadd.f32 %v417_v35, %v306_v56  ;;  %v400_v41 = vpop.f32.mrf.mxu0  ;;  %v428_v45 = vadd.f32 %v427_v36, %v326_v38  ;;  %v410_v55 = vpop.f32.mrf.mxu1  ;;  %vm1274_vm2 = vcmp.eq.f32.partialorder %v508_v39, 8.507059e+37 }
  0xc0   : > { %990 = vpow2.f32 %v901_v32  ;;  %v401_v52 = vadd.f32 %v400_v41, %v271_v51  ;;  %v511_v60 = vor.u32 1.1754944e-38, %v510_v40  ;;  %vm1280_vm4 = vcmp.eq.f32.partialorder %v568_v43, 8.507059e+37 }
  0xc1   : > { %v981_v42 = vpop.eup %980  ;;  %v905_v44 = vmul.f32 -1.442695, %v418_v37  ;;  %v909_v51 = vmul.f32 -1.442695, %v428_v45  ;;  %v571_v6 = vor.u32 1.1754944e-38, %v570_v47  ;;  %v411_v8 = vadd.f32 %v410_v55, %v1249_v53 }
  0xc2   : > { %v983_v46 = vpop.eup %982  ;;  %v1267_v48 = vadd.f32 1.0, %v981_v42  ;;  %v898_v13 = vmul.f32 -1.442695, %v401_v52 }
  0xc3   : > { %v985_v49 = vpop.eup %984  ;;  %v1271_v50 = vadd.f32 1.0, %v983_v46  ;;  %v1295_v32 = vmul.f32 -1.442695, %v411_v8 }
  0xc4   : > { %v987_v56 = vpop.eup %986  ;;  %v500_v58 = vmul.f32 %v985_v49, %v1257_v27  ;;  %992 = vrcp.f32 %v1267_v48  ;;  %vm505_vm5 = vweird.f32 %v985_v49  ;;  %v628_v10 = vand.u32 2147483647, %v1267_v48 }
  0xc5   : > { %v989_v61 = vpop.eup %988  ;;  %v560_v62 = vmul.f32 %v987_v56, %v1259_v31  ;;  %994 = vpow2.f32 %v905_v44  ;;  %v630_v17 = vand.u32 2147483648, %v1267_v48  ;;  %vm565_vm6 = vweird.f32 %v987_v56  ;;  %vm506_vm7 = vmor %vm504_vm0, %vm505_vm5 }
  0xc6   : > { %v991_v0 = vpop.eup %990  ;;  %v501_v1 = vsub.f32 1.0, %v500_v58  ;;  %996 = vrcp.f32 %v1271_v50  ;;  %v1288_v18 = vadd.f32 1.0, %v989_v61  ;;  %v688_v23 = vand.u32 2147483647, %v1271_v50  ;;  %vm566_vm10 = vmor %vm564_vm1, %vm565_vm6  ;;  %v420_v45 = vpop.f32.mrf.mxu2 }
  0xc7   : > { %v561_v9 = vsub.f32 1.0, %v560_v62  ;;  %v1290_v19 = vadd.f32 1.0, %v991_v0  ;;  %998 = vpow2.f32 %v909_v51  ;;  %v690_v53 = vand.u32 2147483648, %v1271_v50  ;;  %v1339_v0 = vpop.permute.xlu2 %315 }
  0xc8   : > { %v502_v14 = vmul.f32 %v985_v49, %v501_v1  ;;  %1000 = vrcp.f32 %v1288_v18  ;;  %vm624_vm8 = vweird.f32 %v1267_v48  ;;  %vm684_vm9 = vweird.f32 %v1271_v50 }
  0xc9   : > { %v562_v22 = vmul.f32 %v987_v56, %v561_v9  ;;  %vm1306_vm11 = vcmp.eq.f32.partialorder %v628_v10, 8.507059e+37  ;;  %v631_v41 = vor.u32 1.1754944e-38, %v630_v17  ;;  %1002 = vrcp.f32 %v1290_v19 }
  0xca   : > { %v993_v26 = vpop.eup %992  ;;  %v503_v28 = vadd.f32 %v985_v49, %v502_v14  ;;  %vm1321_vm12 = vcmp.eq.f32.partialorder %v688_v23, 8.507059e+37  ;;  %v523_v52 = vand.u32 2147483647, %v1288_v18  ;;  %vm519_vm14 = vweird.f32 %v1288_v18 }
  0xcb   : > { %v995_v35 = vpop.eup %994  ;;  %v563_v36 = vadd.f32 %v987_v56, %v562_v22  ;;  %v620_v37 = vmul.f32 %v993_v26, %v1267_v48  ;;  %vm625_vm13 = vweird.f32 %v993_v26  ;;  %1004 = vpow2.f32 %v898_v13 }
  0xcc   : > { %v997_v38 = vpop.eup %996  ;;  %v507_v39 = vsel %vm506_vm7, %v985_v49, %v503_v28  ;;  %v691_v49 = vor.u32 1.1754944e-38, %v690_v53  ;;  %v1333_v61 = vadd.f32 1.0, %v995_v35  ;;  %vm626_vm0 = vmor %vm624_vm8, %vm625_vm13  ;;  %vm1344_vm1 = vcmp.eq.f32.partialorder %v523_v52, 8.507059e+37 }
  0xcd   : > { %v512_v27 = vsel %vm1274_vm2, %v511_v60, %v507_v39  ;;  %v567_v42 = vsel %vm566_vm10, %v987_v56, %v563_v36  ;;  %v621_v31 = vsub.f32 1.0, %v620_v37  ;;  %v680_v43 = vmul.f32 %v997_v38, %v1271_v50  ;;  %v999_v55 = vpop.eup %998 }
  0xce   : > { %v739_v46 = vmul.f32 %v512_v27, %v1203_v33  ;;  %v572_v47 = vsel %vm1280_vm4, %v571_v6, %v567_v42  ;;  %v1001_v60 = vpop.eup %1000  ;;  %v421_v33 = vadd.f32 %v420_v45, %v1255_v2  ;;  %vm685_vm15 = vweird.f32 %v997_v38 }
  0xcf   : > { %v743_v56 = vmul.f32 %v572_v47, %v1178_v24  ;;  %v622_v58 = vmul.f32 %v993_v26, %v621_v31  ;;  %v681_v59 = vsub.f32 1.0, %v680_v43  ;;  %v515_v24 = vmul.f32 %v1001_v60, %v1288_v18  ;;  %v1003_v51 = vpop.eup %1002  ;;  %vm686_vm2 = vmor %vm684_vm9, %vm685_vm15  ;;  %v331_v52 = vpop.permute.xlu2 %330 }
  0xd0   : > { %756 = vst.msk [vmem:[%s1316_s26] sm:$0xff] %vm755_vm3, %v739_v46  ;;  %v525_v2 = vand.u32 2147483648, %v1288_v18  ;;  %1006 = vrcp.f32 %v1333_v61  ;;  %v1350_v6 = vadd.f32 1.0, %v999_v55  ;;  %v575_v13 = vmul.f32 %v1003_v51, %v1290_v19 }
  0xd1   : > { %760 = vst.msk [vmem:[%s1316_s26 + $0x20] sm:$0xff] %vm755_vm3, %v743_v56  ;;  %v623_v62 = vadd.f32 %v993_v26, %v622_v58  ;;  %v682_v63 = vmul.f32 %v997_v38, %v681_v59  ;;  %v516_v10 = vsub.f32 1.0, %v515_v24  ;;  %vm520_vm4 = vweird.f32 %v1001_v60  ;;  %v1005_v53 = vpop.eup %1004 }
  0xd2   : > { %v583_v14 = vand.u32 2147483647, %v1290_v19  ;;  %v585_v17 = vand.u32 2147483648, %v1290_v19  ;;  %v576_v28 = vsub.f32 1.0, %v575_v13  ;;  %v526_v36 = vor.u32 1.1754944e-38, %v525_v2  ;;  %vm521_vm7 = vmor %vm519_vm14, %vm520_vm4 }
  0xd3   : > { %v627_v8 = vsel %vm626_vm0, %v993_v26, %v623_v62  ;;  %v683_v9 = vadd.f32 %v997_v38, %v682_v63  ;;  %v517_v26 = vmul.f32 %v1001_v60, %v516_v10  ;;  %vm579_vm5 = vweird.f32 %v1290_v19  ;;  %v402_v62 = vpop.f32.mrf.mxu0  ;;  %v412_v63 = vpop.f32.mrf.mxu1 }
  0xd4   : > { %v632_v48 = vsel %vm1306_vm11, %v631_v41, %v627_v8  ;;  %1008 = vrcp.f32 %v1350_v6  ;;  %v577_v39 = vmul.f32 %v1003_v51, %v576_v28  ;;  %vm580_vm6 = vweird.f32 %v1003_v51 }
  0xd5   : > { %v747_v22 = vmul.f32 %v632_v48, %v1153_v15  ;;  %v687_v23 = vsel %vm686_vm2, %v997_v38, %v683_v9  ;;  %v518_v37 = vadd.f32 %v1001_v60, %v517_v26  ;;  %v430_v15 = vpop.f32.mrf.mxu3  ;;  %vm1370_vm8 = vcmp.eq.f32.partialorder %v583_v14, 8.507059e+37  ;;  %vm581_vm9 = vmor %vm579_vm5, %vm580_vm6 }
  0xd6   : > { %v692_v35 = vsel %vm1321_vm12, %v691_v49, %v687_v23  ;;  %v1007_v38 = vpop.eup %1006  ;;  %v643_v41 = vand.u32 2147483647, %v1333_v61  ;;  %v1375_v27 = vadd.f32 1.0, %v1005_v53  ;;  %1010 = vpow2.f32 %v1295_v32 }
  0xd7   : > { %764 = vst.msk [vmem:[%s1316_s26 + $0x40] sm:$0xff] %vm755_vm3, %v747_v22  ;;  %v751_v50 = vmul.f32 %v692_v35, %v1126_v5  ;;  %v522_v5 = vsel %vm521_vm7, %v1001_v60, %v518_v37  ;;  %v578_v42 = vadd.f32 %v1003_v51, %v577_v39  ;;  %v586_v31 = vor.u32 1.1754944e-38, %v585_v17  ;;  %v422_v17 = vpop.f32.mrf.mxu2 }
  0xd8   : > { %v635_v43 = vmul.f32 %v1007_v38, %v1333_v61  ;;  %v527_v18 = vsel %vm1344_vm1, %v526_v36, %v522_v5  ;;  %vm639_vm10 = vweird.f32 %v1333_v61  ;;  %v645_v44 = vand.u32 2147483648, %v1333_v61 }
  0xd9   : > { %768 = vst.msk [vmem:[%s1316_s26 + $0x60] sm:$0xff] %vm755_vm3, %v751_v50  ;;  %1012 = vrcp.f32 %v1375_v27  ;;  %v740_v32 = vmul.f32 %v527_v18, %v1206_v34  ;;  %v582_v45 = vsel %vm581_vm9, %v1003_v51, %v578_v42  ;;  %v703_v47 = vand.u32 2147483647, %v1350_v6 }
  0xda   : > { %v636_v46 = vsub.f32 1.0, %v635_v43  ;;  %v1009_v49 = vpop.eup %1008  ;;  %v587_v55 = vsel %vm1370_vm8, %v586_v31, %v582_v45  ;;  %vm1392_vm11 = vcmp.eq.f32.partialorder %v643_v41, 8.507059e+37  ;;  %v705_v56 = vand.u32 2147483648, %v1350_v6 }
  0xdb   : > { %v906_v58 = vmul.f32 -1.442695, %v421_v33  ;;  %757 = vst.msk [vmem:[%s1316_s26 + $0x8] sm:$0xff] %vm755_vm3, %v740_v32  ;;  %v744_v34 = vmul.f32 %v587_v55, %v1181_v25  ;;  %vm640_vm12 = vweird.f32 %v1007_v38  ;;  %v695_v60 = vmul.f32 %v1009_v49, %v1350_v6 }
  0xdc   : > { %v637_v59 = vmul.f32 %v1007_v38, %v636_v46  ;;  %v1011_v24 = vpop.eup %1010  ;;  %v646_v51 = vor.u32 1.1754944e-38, %v645_v44  ;;  %vm699_vm13 = vweird.f32 %v1350_v6  ;;  %v431_v1 = vadd.f32 %v430_v15, %v331_v52  ;;  %vm641_vm15 = vmor %vm639_vm10, %vm640_vm12 }
  0xdd   : > { %1014 = vpow2.f32 %v906_v58  ;;  %761 = vst.msk [vmem:[%s1316_s26 + $0x28] sm:$0xff] %vm755_vm3, %v744_v34  ;;  %v696_v33 = vsub.f32 1.0, %v695_v60  ;;  %vm1404_vm14 = vcmp.eq.f32.partialorder %v703_v47, 8.507059e+37  ;;  %v1408_v25 = vadd.f32 1.0, %v1011_v24  ;;  %v432_v28 = vpop.f32.mrf.mxu3 }
  0xde   : > { %v638_v2 = vadd.f32 %v1007_v38, %v637_v59  ;;  %v706_v10 = vor.u32 1.1754944e-38, %v705_v56  ;;  %v910_v13 = vmul.f32 -1.442695, %v431_v1  ;;  %v403_v48 = vadd.f32 %v402_v62, %v1251_v54  ;;  %v336_v54 = vpop.permute.xlu0 %335 }
  0xdf   : > { %v1013_v9 = vpop.eup %1012  ;;  %v413_v14 = vadd.f32 %v412_v63, %v1253_v57  ;;  %v697_v23 = vmul.f32 %v1009_v49, %v696_v33  ;;  %vm700_vm0 = vweird.f32 %v1009_v49  ;;  %v538_v61 = vand.u32 2147483647, %v1375_v27 }
  0xe0   : > { %v642_v22 = vsel %vm641_vm15, %v1007_v38, %v638_v2  ;;  %v530_v26 = vmul.f32 %v1013_v9, %v1375_v27  ;;  %v540_v35 = vand.u32 2147483648, %v1375_v27  ;;  %1016 = vrcp.f32 %v1408_v25  ;;  %vm701_vm1 = vmor %vm699_vm13, %vm700_vm0 }
  0xe1   : > { %v647_v53 = vsel %vm1392_vm11, %v646_v51, %v642_v22  ;;  %v698_v36 = vadd.f32 %v1009_v49, %v697_v23  ;;  %v423_v37 = vadd.f32 %v422_v17, %v1339_v0  ;;  %1018 = vpow2.f32 %v910_v13 }
  0xe2   : > { %v748_v57 = vmul.f32 %v647_v53, %v1156_v16  ;;  %v531_v50 = vsub.f32 1.0, %v530_v26  ;;  %v899_v15 = vmul.f32 -1.442695, %v403_v48  ;;  %v903_v38 = vmul.f32 -1.442695, %v413_v14 }
  0xe3   : > { %v1015_v39 = vpop.eup %1014  ;;  %v433_v40 = vadd.f32 %v432_v28, %v336_v54  ;;  %v702_v41 = vsel %vm701_vm1, %v1009_v49, %v698_v36  ;;  %vm535_vm2 = vweird.f32 %v1013_v9  ;;  %vm534_vm4 = vweird.f32 %v1375_v27 }
  0xe4   : > { %765 = vst.msk [vmem:[%s1316_s26 + $0x48] sm:$0xff] %vm755_vm3, %v748_v57  ;;  %v532_v5 = vmul.f32 %v1013_v9, %v531_v50  ;;  %v1427_v42 = vadd.f32 1.0, %v1015_v39  ;;  %v707_v16 = vsel %vm1404_vm14, %v706_v10, %v702_v41  ;;  %1020 = vpow2.f32 %v899_v15  ;;  %vm536_vm5 = vmor %vm534_vm4, %vm535_vm2 }
  0xe5   : > { %v752_v0 = vmul.f32 %v707_v16, %v1131_v7  ;;  %v907_v31 = vmul.f32 -1.442695, %v423_v37  ;;  %v541_v18 = vor.u32 1.1754944e-38, %v540_v35  ;;  %v911_v44 = vmul.f32 -1.442695, %v433_v40 }
  0xe6   : > { %v533_v6 = vadd.f32 %v1013_v9, %v532_v5  ;;  %1022 = vrcp.f32 %v1427_v42  ;;  %v1017_v43 = vpop.eup %1016  ;;  %vm539_vm6 = vcmp.eq.f32.partialorder %v538_v61, 8.507059e+37  ;;  %v600_v55 = vand.u32 2147483648, %v1408_v25 }
  0xe7   : > { %1024 = vpow2.f32 %v903_v38  ;;  %769 = vst.msk [vmem:[%s1316_s26 + $0x68] sm:$0xff] %vm755_vm3, %v752_v0  ;;  %v590_v45 = vmul.f32 %v1017_v43, %v1408_v25  ;;  %v1019_v27 = vpop.eup %1018  ;;  %vm595_vm7 = vweird.f32 %v1017_v43  ;;  %v598_v58 = vand.u32 2147483647, %v1408_v25 }
  0xe8   : > { %v537_v32 = vsel %vm536_vm5, %v1013_v9, %v533_v6  ;;  %v1438_v49 = vadd.f32 1.0, %v1019_v27  ;;  %1026 = vpow2.f32 %v907_v31  ;;  %vm594_vm8 = vweird.f32 %v1408_v25 }
  0xe9   : > { %v542_v46 = vsel %vm539_vm6, %v541_v18, %v537_v32  ;;  %v591_v47 = vsub.f32 1.0, %v590_v45  ;;  %1028 = vpow2.f32 %v911_v44  ;;  %vm596_vm9 = vmor %vm594_vm8, %vm595_vm7  ;;  %v601_v63 = vor.u32 1.1754944e-38, %v600_v55 }
  0xea   : > { %v741_v7 = vmul.f32 %v542_v46, %v1192_v29  ;;  %v1021_v52 = vpop.eup %1020  ;;  %1030 = vrcp.f32 %v1438_v49  ;;  %vm599_vm10 = vcmp.eq.f32.partialorder %v598_v58, 8.507059e+37  ;;  %v660_v2 = vand.u32 2147483648, %v1427_v42 }
  0xeb   : > { %v592_v56 = vmul.f32 %v1017_v43, %v591_v47  ;;  %v1446_v59 = vadd.f32 1.0, %v1021_v52  ;;  %v658_v25 = vand.u32 2147483647, %v1427_v42  ;;  %vm654_vm12 = vweird.f32 %v1427_v42 }
  0xec   : > { %v1023_v19 = vpop.eup %1022  ;;  %758 = vst.msk [vmem:[%s1316_s26 + $0x10] sm:$0xff] %vm755_vm3, %v741_v7  ;;  %v661_v17 = vor.u32 1.1754944e-38, %v660_v2  ;;  %v718_v22 = vand.u32 2147483647, %v1438_v49  ;;  %v720_v23 = vand.u32 2147483648, %v1438_v49  ;;  %vm714_vm0 = vweird.f32 %v1438_v49 }
  0xed   : > { %v1025_v34 = vpop.eup %1024  ;;  %v650_v29 = vmul.f32 %v1023_v19, %v1427_v42  ;;  %v593_v60 = vadd.f32 %v1017_v43, %v592_v56  ;;  %1032 = vrcp.f32 %v1446_v59  ;;  %vm655_vm11 = vweird.f32 %v1023_v19 }
  0xee   : > { %v1449_v62 = vadd.f32 1.0, %v1025_v34  ;;  %v1027_v51 = vpop.eup %1026  ;;  %vm656_vm13 = vmor %vm654_vm12, %vm655_vm11  ;;  %vm659_vm14 = vcmp.eq.f32.partialorder %v658_v25, 8.507059e+37  ;;  %vm1471_vm1 = vcmp.eq.f32.partialorder %v718_v22, 8.507059e+37  ;;  %v721_v15 = vor.u32 1.1754944e-38, %v720_v23 }
  0xef   : > { %v651_v24 = vsub.f32 1.0, %v650_v29  ;;  %v597_v1 = vsel %vm596_vm9, %v1017_v43, %v593_v60  ;;  %v1029_v33 = vpop.eup %1028  ;;  %v1462_v26 = vadd.f32 1.0, %v1027_v51  ;;  %v555_v41 = vand.u32 2147483648, %v1446_v59 }
  0xf0   : > { %1034 = vrcp.f32 %v1449_v62  ;;  %v602_v8 = vsel %vm599_vm10, %v601_v63, %v597_v1  ;;  %v1031_v10 = vpop.eup %1030  ;;  %v1464_v61 = vadd.f32 1.0, %v1029_v33  ;;  %v553_v42 = vand.u32 2147483647, %v1446_v59 }
  0xf1   : > { %v652_v9 = vmul.f32 %v1023_v19, %v651_v24  ;;  %v745_v13 = vmul.f32 %v602_v8, %v1167_v20  ;;  %v710_v14 = vmul.f32 %v1031_v10, %v1438_v49  ;;  %1036 = vrcp.f32 %v1462_v26 }
  0xf2   : > { %vm715_vm15 = vweird.f32 %v1031_v10  ;;  %1038 = vrcp.f32 %v1464_v61  ;;  %v615_v16 = vand.u32 2147483648, %v1449_v62  ;;  %v613_v31 = vand.u32 2147483647, %v1449_v62 }
  0xf3   : > { %v653_v48 = vadd.f32 %v1023_v19, %v652_v9  ;;  %762 = vst.msk [vmem:[%s1316_s26 + $0x30] sm:$0xff] %vm755_vm3, %v745_v13  ;;  %v1033_v28 = vpop.eup %1032  ;;  %v711_v20 = vsub.f32 1.0, %v710_v14  ;;  %vm716_vm2 = vmor %vm714_vm0, %vm715_vm15  ;;  %vm549_vm6 = vweird.f32 %v1446_v59  ;;  %vm609_vm7 = vweird.f32 %v1449_v62 }
  0xf4   : > { %v545_v57 = vmul.f32 %v1033_v28, %v1446_v59  ;;  %vm550_vm4 = vweird.f32 %v1033_v28  ;;  %v556_v45 = vor.u32 1.1754944e-38, %v555_v41  ;;  %vm554_vm9 = vcmp.eq.f32.partialorder %v553_v42, 8.507059e+37 }
  0xf5   : > { %v657_v53 = vsel %vm656_vm13, %v1023_v19, %v653_v48  ;;  %v712_v50 = vmul.f32 %v1031_v10, %v711_v20  ;;  %vm551_vm8 = vmor %vm549_vm6, %vm550_vm4  ;;  %v616_v47 = vor.u32 1.1754944e-38, %v615_v16  ;;  %vm614_vm11 = vcmp.eq.f32.partialorder %v613_v31, 8.507059e+37 }
  0xf6   : > { %v1035_v35 = vpop.eup %1034  ;;  %v662_v54 = vsel %vm659_vm14, %v661_v17, %v657_v53  ;;  %v546_v38 = vsub.f32 1.0, %v545_v57  ;;  %v675_v58 = vand.u32 2147483648, %v1462_v26  ;;  %v673_v60 = vand.u32 2147483647, %v1462_v26 }
  0xf7   : > { %v749_v36 = vmul.f32 %v662_v54, %v1142_v11  ;;  %v605_v37 = vmul.f32 %v1035_v35, %v1449_v62  ;;  %v713_v40 = vadd.f32 %v1031_v10, %v712_v50  ;;  %vm610_vm5 = vweird.f32 %v1035_v35  ;;  %v1037_v43 = vpop.eup %1036 }
  0xf8   : > { %v547_v11 = vmul.f32 %v1033_v28, %v546_v38  ;;  %v665_v46 = vmul.f32 %v1037_v43, %v1462_v26  ;;  %vm611_vm10 = vmor %vm609_vm7, %vm610_vm5  ;;  %v1039_v49 = vpop.eup %1038  ;;  %vm670_vm12 = vweird.f32 %v1037_v43  ;;  %vm669_vm13 = vweird.f32 %v1462_v26 }
  0xf9   : > { %766 = vst.msk [vmem:[%s1316_s26 + $0x50] sm:$0xff] %vm755_vm3, %v749_v36  ;;  %v606_v5 = vsub.f32 1.0, %v605_v37  ;;  %v717_v0 = vsel %vm716_vm2, %v1031_v10, %v713_v40  ;;  %v725_v34 = vmul.f32 %v1039_v49, %v1464_v61  ;;  %vm671_vm14 = vmor %vm669_vm13, %vm670_vm12  ;;  %v676_v24 = vor.u32 1.1754944e-38, %v675_v58 }
  0xfa   : > { %v722_v18 = vsel %vm1471_vm1, %v721_v15, %v717_v0  ;;  %v548_v44 = vadd.f32 %v1033_v28, %v547_v11  ;;  %v666_v19 = vsub.f32 1.0, %v665_v46  ;;  %vm730_vm15 = vweird.f32 %v1039_v49 }
  0xfb   : > { %v607_v6 = vmul.f32 %v1035_v35, %v606_v5  ;;  %v753_v32 = vmul.f32 %v722_v18, %v1120_v3  ;;  %v726_v62 = vsub.f32 1.0, %v725_v34  ;;  %vm674_vm0 = vcmp.eq.f32.partialorder %v673_v60, 8.507059e+37 }
  0xfc   : > { %v552_v7 = vsel %vm551_vm8, %v1033_v28, %v548_v44  ;;  %v667_v59 = vmul.f32 %v1037_v43, %v666_v19  ;;  %vm729_vm1 = vweird.f32 %v1464_v61 }
  0xfd   : > { %v608_v27 = vadd.f32 %v1035_v35, %v607_v6  ;;  %770 = vst.msk [vmem:[%s1316_s26 + $0x70] sm:$0xff] %vm755_vm3, %v753_v32  ;;  %v557_v52 = vsel %vm554_vm9, %v556_v45, %v552_v7  ;;  %v727_v51 = vmul.f32 %v1039_v49, %v726_v62  ;;  %vm731_vm2 = vmor %vm729_vm1, %vm730_vm15 }
  0xfe   : > { %v742_v3 = vmul.f32 %v557_v52, %v1195_v30  ;;  %v668_v63 = vadd.f32 %v1037_v43, %v667_v59  ;;  %v735_v30 = vand.u32 2147483648, %v1464_v61 }
  0xff   : > { %v612_v55 = vsel %vm611_vm10, %v1035_v35, %v608_v27  ;;  %v728_v33 = vadd.f32 %v1039_v49, %v727_v51 }
 0x100   : > { %v617_v56 = vsel %vm614_vm11, %v616_v47, %v612_v55  ;;  %759 = vst.msk [vmem:[%s1316_s26 + $0x18] sm:$0xff] %vm755_vm3, %v742_v3  ;;  %v672_v1 = vsel %vm671_vm14, %v1037_v43, %v668_v63  ;;  %v736_v9 = vor.u32 1.1754944e-38, %v735_v30 }
 0x101   : > { %v746_v29 = vmul.f32 %v617_v56, %v1170_v21  ;;  %v733_v21 = vand.u32 2147483647, %v1464_v61  ;;  %v677_v2 = vsel %vm674_vm0, %v676_v24, %v672_v1  ;;  %v732_v25 = vsel %vm731_vm2, %v1039_v49, %v728_v33 }
 0x102   : > { %v750_v8 = vmul.f32 %v677_v2, %v1145_v12 }
 0x103   : > { %763 = vst.msk [vmem:[%s1316_s26 + $0x38] sm:$0xff] %vm755_vm3, %v746_v29  ;;  %vm734_vm4 = vcmp.eq.f32.partialorder %v733_v21, 8.507059e+37 }
 0x104   : > { %767 = vst.msk [vmem:[%s1316_s26 + $0x58] sm:$0xff] %vm755_vm3, %v750_v8  ;;  %v737_v10 = vsel %vm734_vm4, %v736_v9, %v732_v25 }
 0x105   : > { %v754_v13 = vmul.f32 %v737_v10, %v1123_v4 }
 0x107   : > { %771 = vst.msk [vmem:[%s1316_s26 + $0x78] sm:$0xff] %vm755_vm3, %v754_v13 }
 0x108 PF: > { %s13_s14 = sadd.s32 1, %s1062_s14   ;;  %s1540_s12 = smov %s1058_s13 }
 0x109   : > { %p10_p5 = scmp.ge.s32.totalorder %s13_s14, 4   ;;  %s1541_s13 = smov %s1543_s15 }
 0x10b   :  { %12 = sbr.rel (!%p10_p5) target bundleno = 2 (0x2), region = 62 }

</bundles_post_ra>
